<compile_context>
chip_gen: v7x
topology: tpu7x:2x2x1
jax: 0.10.0
libtpu: 0.0.40
codegen_flags: <defaults>
</compile_context>

<pallas_src>
import jax
import jax.numpy as jnp
from jax.experimental import pallas as pl
from jax.experimental.pallas import tpu as pltpu


# ---------------------------------------------------------------------------
# Kernel
# ---------------------------------------------------------------------------
def ffnn_kernel(x_ref, w1_ref, b1_ref, w2_ref, b2_ref, w3t_ref, b3_ref, o_ref):
    # ---- layer 1: bf16 MXU matmul, f32 accumulate, bias, relu ---------------
    h1 = jnp.dot(x_ref[...], w1_ref[...],
                 preferred_element_type=jnp.float32) + b1_ref[...]     # [TB,128] f32
    h1 = jnp.maximum(h1, 0.0).astype(jnp.bfloat16)                     # bf16 for next MXU dot

    # ---- layer 2: bf16 MXU matmul, f32 accumulate ---------------------------
    # w2/b2 were pre-scaled by 0.5 so sigmoid(z) = 0.5*(tanh(z/2)+1) reduces to
    # a single EUP tanh here; the trailing 0.5*(t+1) affine is folded into
    # layer 3's weights/bias (exact).
    z2 = jnp.dot(h1, w2_ref[...],
                 preferred_element_type=jnp.float32) + b2_ref[...]     # [TB,1024] f32
    t = jnp.tanh(z2)                                                   # [TB,1024] f32

    # ---- layer 3 on the VPU/XLU (not the MXU) -------------------------------
    # With N=4 the MXU would spend as many pushes here as on layer 2 for ~1/32
    # of the FLOPs.  Instead: 4 broadcast-multiplies + cross-lane reduces,
    # which land in VLIW slots that otherwise have slack.
    # w3t holds (0.5*w3)^T padded; b3_ref holds b3 + 0.5*colsum(w3).
    cols = [jnp.sum(t * w3t_ref[pl.ds(j, 1), :], axis=-1, keepdims=True)
            for j in range(4)]
    h3 = jnp.concatenate(cols, axis=-1) + b3_ref[...]                  # [TB,4] f32

    # final sigmoid on the tiny [TB,4] tensor (single EUP tanh per element)
    h3 = 0.5 * (jnp.tanh(0.5 * h3) + 1.0)

    # numerically stable log_softmax over the 4 classes
    m = jnp.max(h3, axis=-1, keepdims=True)
    z = h3 - m
    lse = jnp.log(jnp.sum(jnp.exp(z), axis=-1, keepdims=True))
    o_ref[...] = z - lse


# ---------------------------------------------------------------------------
# Wrapper
# ---------------------------------------------------------------------------
def _round_up(n, m):
    return ((n + m - 1) // m) * m


def _pad_params(params):
    """Lane-pad hidden dims (100->128, 1000->1024), fold sigmoid constants,
    and pre-cast the MXU weights to bf16 (one-time, outside the kernel)."""
    w1, b1, w2, b2, w3, b3 = params

    # layer 1: zero-pad the 100 hidden cols to 128 (padded h1 cols are 0).
    w1p = jnp.pad(w1, ((0, 0), (0, 28))).astype(jnp.bfloat16)          # [10, 128]
    b1p = jnp.pad(b1, ((0, 0), (0, 28)))                               # [1, 128] f32

    # layer 2: fold the 0.5 of sigmoid(x)=0.5*(tanh(0.5x)+1) into w2/b2 and
    # zero-pad 100->128 rows, 1000->1024 cols (padded z2 cols are 0 -> tanh 0).
    w2p = jnp.pad(0.5 * w2, ((0, 28), (0, 24))).astype(jnp.bfloat16)   # [128, 1024]
    b2p = jnp.pad(0.5 * b2, ((0, 0), (0, 24)))                         # [1, 1024] f32

    # layer 3: absorb the remaining 0.5*(t+1) affine:
    #   sigmoid @ w3 + b3 == t @ (0.5*w3) + (b3 + 0.5*colsum(w3)).
    # Stored transposed [4, 1024] f32 for the VPU broadcast-multiply path.
    w3t = jnp.pad(0.5 * w3, ((0, 24), (0, 0))).T                       # [4, 1024] f32
    b3p = b3 + 0.5 * jnp.sum(w3, axis=0, keepdims=True)                # [1, 4]   f32

    return w1p, b1p, w2p, b2p, w3t, b3p


def ffnn_forward(x, params, *, tile_b=1024):
    w1p, b1p, w2p, b2p, w3t, b3p = _pad_params(params)

    B = x.shape[0]
    MIN_TILE = 16  # bf16 packs 16 rows per sublane-packed vreg
    tile_b = max(MIN_TILE,
                 min(_round_up(tile_b, MIN_TILE), _round_up(B, MIN_TILE)))
    b_pad = _round_up(B, MIN_TILE)
    # v7x: guarantee >= 2 grid steps whenever the batch allows, so
    # dimension_semantics=("parallel",) can split across both TensorCores
    # (no effect on single-TC v5e/v6e).
    if b_pad <= tile_b and b_pad >= 2 * MIN_TILE:
        tile_b = _round_up(pl.cdiv(b_pad, 2), MIN_TILE)
    b_pad = _round_up(B, tile_b)
    if b_pad != B:
        x = jnp.pad(x, ((0, b_pad - B), (0, 0)))
    x = x.astype(jnp.bfloat16)                     # bf16 MXU operand
    grid = (b_pad // tile_b,)

    const = lambda i: (0, 0)   # weights/biases: same block every step -> resident
    weight_bytes = (2 * (w1p.size + w2p.size)                 # bf16 weights
                    + 4 * (b1p.size + b2p.size + w3t.size + b3p.size))

    out = pl.pallas_call(
        ffnn_kernel,
        out_shape=jax.ShapeDtypeStruct((b_pad, 4), jnp.float32),
        grid=grid,
        in_specs=[
            pl.BlockSpec((tile_b, 10), lambda i: (i, 0)),   # x, batch-tiled
            pl.BlockSpec(w1p.shape, const),
            pl.BlockSpec(b1p.shape, const),
            pl.BlockSpec(w2p.shape, const),
            pl.BlockSpec(b2p.shape, const),
            pl.BlockSpec(w3t.shape, const),
            pl.BlockSpec(b3p.shape, const),
        ],
        out_specs=pl.BlockSpec((tile_b, 4), lambda i: (i, 0)),
        compiler_params=pltpu.CompilerParams(
            dimension_semantics=("parallel",),          # 2-TC sharding on v7x
            vmem_limit_bytes=32 * 1024 * 1024,          # safe on v5e/v6e/v7x
        ),
        cost_estimate=pl.CostEstimate(
            flops=2 * b_pad * (10 * 128 + 128 * 1024 + 1024 * 4),
            transcendentals=b_pad * (1024 + 4 + 4),
            bytes_accessed=2 * b_pad * 10 + 4 * b_pad * 4 + weight_bytes,
        ),
    )(x, w1p, b1p, w2p, b2p, w3t, b3p)

    return out[:B]


# ---------------------------------------------------------------------------
# Params / reference
# ---------------------------------------------------------------------------
def init_params(key):
    # Deterministic synthetic init (PyTorch-Linear-like uniform scale).
    def linear(key, fan_in, fan_out):
        kw, kb = jax.random.split(key)
        bound = 1.0 / jnp.sqrt(fan_in)
        w = jax.random.uniform(kw, (fan_in, fan_out), jnp.float32, -bound, bound)
        b = jax.random.uniform(kb, (1, fan_out), jnp.float32, -bound, bound)
        return w, b

    k1, k2, k3 = jax.random.split(key, 3)
    w1, b1 = linear(k1, 10, 100)
    w2, b2 = linear(k2, 100, 1000)
    w3, b3 = linear(k3, 1000, 4)
    return (w1, b1, w2, b2, w3, b3)


def ffnn_reference(x, params):
    # Full-f32 reference of the original module's forward pass.
    w1, b1, w2, b2, w3, b3 = params
    h = jnp.maximum(x @ w1 + b1, 0.0)
    h = jax.nn.sigmoid(h @ w2 + b2)
    h = jax.nn.sigmoid(h @ w3 + b3)
    return jax.nn.log_softmax(h, axis=-1)


if __name__ == "__main__":
    key = jax.random.PRNGKey(0)
    kx, kp = jax.random.split(key)

    B = 40                                   # exercises padding + a 2-step grid
    x = jax.random.normal(kx, (B, 10), jnp.float32)
    params = init_params(kp)

    out = jax.block_until_ready(ffnn_forward(x, params))
    ref = ffnn_reference(x, params)

    assert out.shape == (B, 4)
    # bf16 MXU operands (f32 accumulation) -> loosened tolerance vs f32 reference.
    assert jnp.allclose(out, ref, atol=5e-2, rtol=5e-2), \
        float(jnp.max(jnp.abs(out - ref)))

    print("KERNEL_OK")
</pallas_src>

<mosaic_0001>
module attributes {stable_mosaic.version = 11 : i64} {
  func.func @ffnn_kernel(%arg0: i32, %arg1: memref<32x10xbf16, #tpu.memory_space<vmem>>, %arg2: memref<10x128xbf16, #tpu.memory_space<vmem>>, %arg3: memref<1x128xf32, #tpu.memory_space<vmem>>, %arg4: memref<128x1024xbf16, #tpu.memory_space<vmem>>, %arg5: memref<1x1024xf32, #tpu.memory_space<vmem>>, %arg6: memref<4x1024xf32, #tpu.memory_space<vmem>>, %arg7: memref<1x4xf32, #tpu.memory_space<vmem>>, %arg8: memref<32x4xf32, #tpu.memory_space<vmem>>) attributes {dimension_semantics = [#tpu.dimension_semantics<parallel>], iteration_bounds = array<i64: 2>, scalar_prefetch = 0 : i64, scratch_operands = 0 : i64, tpu.core_type = #tpu.core_type<tc>, window_params = [{transform_indices = @transform_0, window_bounds = array<i64: 32, 10>}, {pipeline_mode = #tpu.pipeline_mode<synchronous>, transform_indices = @transform_1, window_bounds = array<i64: 10, 128>}, {pipeline_mode = #tpu.pipeline_mode<synchronous>, transform_indices = @transform_2, window_bounds = array<i64: 1, 128>}, {pipeline_mode = #tpu.pipeline_mode<synchronous>, transform_indices = @transform_3, window_bounds = array<i64: 128, 1024>}, {pipeline_mode = #tpu.pipeline_mode<synchronous>, transform_indices = @transform_4, window_bounds = array<i64: 1, 1024>}, {pipeline_mode = #tpu.pipeline_mode<synchronous>, transform_indices = @transform_5, window_bounds = array<i64: 4, 1024>}, {pipeline_mode = #tpu.pipeline_mode<synchronous>, transform_indices = @transform_6, window_bounds = array<i64: 1, 4>}, {transform_indices = @transform_7, window_bounds = array<i64: 32, 4>}]} {
    %c0 = arith.constant 0 : index
    %c0_0 = arith.constant 0 : index
    %0 = vector.load %arg1[%c0, %c0_0] : memref<32x10xbf16, #tpu.memory_space<vmem>>, vector<32x10xbf16>
    %c0_1 = arith.constant 0 : index
    %c0_2 = arith.constant 0 : index
    %1 = vector.load %arg2[%c0_1, %c0_2] : memref<10x128xbf16, #tpu.memory_space<vmem>>, vector<10x128xbf16>
    %cst = arith.constant dense<0.000000e+00> : vector<32x128xf32>
    %2 = tpu.matmul %0, %1, %cst {dimension_numbers = #tpu.dot_dimension_numbers<[1], [0], [0], [1], [0, 0, 1, 1], [], []>} : vector<32x10xbf16>, vector<10x128xbf16>, vector<32x128xf32> -> vector<32x128xf32>
    %c0_3 = arith.constant 0 : index
    %c0_4 = arith.constant 0 : index
    %3 = vector.load %arg3[%c0_3, %c0_4] : memref<1x128xf32, #tpu.memory_space<vmem>>, vector<1x128xf32>
    %4 = vector.broadcast %3 : vector<1x128xf32> to vector<32x128xf32>
    %5 = arith.addf %2, %4 : vector<32x128xf32>
    %cst_5 = arith.constant 0.000000e+00 : f32
    %6 = vector.broadcast %cst_5 : f32 to vector<32x128xf32>
    %7 = arith.maximumf %5, %6 : vector<32x128xf32>
    %8 = arith.truncf %7 : vector<32x128xf32> to vector<32x128xbf16>
    %c0_6 = arith.constant 0 : index
    %c0_7 = arith.constant 0 : index
    %9 = vector.load %arg4[%c0_6, %c0_7] : memref<128x1024xbf16, #tpu.memory_space<vmem>>, vector<128x1024xbf16>
    %cst_8 = arith.constant dense<0.000000e+00> : vector<32x1024xf32>
    %10 = tpu.matmul %8, %9, %cst_8 {dimension_numbers = #tpu.dot_dimension_numbers<[1], [0], [0], [1], [0, 0, 1, 1], [], []>} : vector<32x128xbf16>, vector<128x1024xbf16>, vector<32x1024xf32> -> vector<32x1024xf32>
    %c0_9 = arith.constant 0 : index
    %c0_10 = arith.constant 0 : index
    %11 = vector.load %arg5[%c0_9, %c0_10] : memref<1x1024xf32, #tpu.memory_space<vmem>>, vector<1x1024xf32>
    %12 = vector.broadcast %11 : vector<1x1024xf32> to vector<32x1024xf32>
    %13 = arith.addf %10, %12 : vector<32x1024xf32>
    %14 = math.tanh %13 : vector<32x1024xf32>
    %c0_11 = arith.constant 0 : index
    %c0_12 = arith.constant 0 : index
    %15 = vector.load %arg6[%c0_11, %c0_12] : memref<4x1024xf32, #tpu.memory_space<vmem>>, vector<1x1024xf32>
    %16 = vector.broadcast %15 : vector<1x1024xf32> to vector<32x1024xf32>
    %17 = arith.mulf %14, %16 : vector<32x1024xf32>
    %cst_13 = arith.constant dense<0.000000e+00> : vector<32xf32>
    %18 = vector.multi_reduction <add>, %17, %cst_13 [1] : vector<32x1024xf32> to vector<32xf32>
    %19 = vector.shape_cast %18 : vector<32xf32> to vector<32x1xf32>
    %c1 = arith.constant 1 : index
    %c0_14 = arith.constant 0 : index
    %20 = vector.load %arg6[%c1, %c0_14] : memref<4x1024xf32, #tpu.memory_space<vmem>>, vector<1x1024xf32>
    %21 = vector.broadcast %20 : vector<1x1024xf32> to vector<32x1024xf32>
    %22 = arith.mulf %14, %21 : vector<32x1024xf32>
    %cst_15 = arith.constant dense<0.000000e+00> : vector<32xf32>
    %23 = vector.multi_reduction <add>, %22, %cst_15 [1] : vector<32x1024xf32> to vector<32xf32>
    %24 = vector.shape_cast %23 : vector<32xf32> to vector<32x1xf32>
    %c2 = arith.constant 2 : index
    %c0_16 = arith.constant 0 : index
    %25 = vector.load %arg6[%c2, %c0_16] : memref<4x1024xf32, #tpu.memory_space<vmem>>, vector<1x1024xf32>
    %26 = vector.broadcast %25 : vector<1x1024xf32> to vector<32x1024xf32>
    %27 = arith.mulf %14, %26 : vector<32x1024xf32>
    %cst_17 = arith.constant dense<0.000000e+00> : vector<32xf32>
    %28 = vector.multi_reduction <add>, %27, %cst_17 [1] : vector<32x1024xf32> to vector<32xf32>
    %29 = vector.shape_cast %28 : vector<32xf32> to vector<32x1xf32>
    %c3 = arith.constant 3 : index
    %c0_18 = arith.constant 0 : index
    %30 = vector.load %arg6[%c3, %c0_18] : memref<4x1024xf32, #tpu.memory_space<vmem>>, vector<1x1024xf32>
    %31 = vector.broadcast %30 : vector<1x1024xf32> to vector<32x1024xf32>
    %32 = arith.mulf %14, %31 : vector<32x1024xf32>
    %cst_19 = arith.constant dense<0.000000e+00> : vector<32xf32>
    %33 = vector.multi_reduction <add>, %32, %cst_19 [1] : vector<32x1024xf32> to vector<32xf32>
    %34 = vector.shape_cast %33 : vector<32xf32> to vector<32x1xf32>
    %35 = tpu.concatenate %19, %24, %29, %34 in 1 : vector<32x1xf32>, vector<32x1xf32>, vector<32x1xf32>, vector<32x1xf32> -> vector<32x4xf32>
    %c0_20 = arith.constant 0 : index
    %c0_21 = arith.constant 0 : index
    %36 = vector.load %arg7[%c0_20, %c0_21] : memref<1x4xf32, #tpu.memory_space<vmem>>, vector<1x4xf32>
    %37 = vector.broadcast %36 : vector<1x4xf32> to vector<32x4xf32>
    %38 = arith.addf %35, %37 : vector<32x4xf32>
    %cst_22 = arith.constant 5.000000e-01 : f32
    %39 = vector.broadcast %cst_22 : f32 to vector<32x4xf32>
    %40 = arith.mulf %39, %38 : vector<32x4xf32>
    %41 = math.tanh %40 : vector<32x4xf32>
    %cst_23 = arith.constant 1.000000e+00 : f32
    %42 = vector.broadcast %cst_23 : f32 to vector<32x4xf32>
    %43 = arith.addf %41, %42 : vector<32x4xf32>
    %cst_24 = arith.constant 5.000000e-01 : f32
    %44 = vector.broadcast %cst_24 : f32 to vector<32x4xf32>
    %45 = arith.mulf %44, %43 : vector<32x4xf32>
    %cst_25 = arith.constant dense<0xFF800000> : vector<32xf32>
    %46 = vector.multi_reduction <maximumf>, %45, %cst_25 [1] : vector<32x4xf32> to vector<32xf32>
    %47 = vector.shape_cast %46 : vector<32xf32> to vector<32x1xf32>
    %48 = vector.broadcast %47 : vector<32x1xf32> to vector<32x4xf32>
    %49 = arith.subf %45, %48 : vector<32x4xf32>
    %50 = math.exp %49 : vector<32x4xf32>
    %cst_26 = arith.constant dense<0.000000e+00> : vector<32xf32>
    %51 = vector.multi_reduction <add>, %50, %cst_26 [1] : vector<32x4xf32> to vector<32xf32>
    %52 = vector.shape_cast %51 : vector<32xf32> to vector<32x1xf32>
    %53 = math.log %52 : vector<32x1xf32>
    %54 = vector.broadcast %53 : vector<32x1xf32> to vector<32x4xf32>
    %55 = arith.subf %49, %54 : vector<32x4xf32>
    %c0_27 = arith.constant 0 : index
    %c0_28 = arith.constant 0 : index
    %56 = vector.load %arg8[%c0_27, %c0_28] : memref<32x4xf32, #tpu.memory_space<vmem>>, vector<32x4xf32>
    tpu.vector_store %arg8[%c0_27, %c0_28], %55 {strides = array<i32>} : memref<32x4xf32, #tpu.memory_space<vmem>>, vector<32x4xf32>,
    return
  }
  func.func @transform_0(%arg0: i32) -> (i32, i32) {
    %c0_i32 = arith.constant 0 : i32
    %c0_i32_0 = arith.constant 0 : i32
    return %arg0, %c0_i32 : i32, i32
  }
  func.func @transform_1(%arg0: i32) -> (i32, i32) {
    %c0_i32 = arith.constant 0 : i32
    %c0_i32_0 = arith.constant 0 : i32
    %c0_i32_1 = arith.constant 0 : i32
    return %c0_i32, %c0_i32_0 : i32, i32
  }
  func.func @transform_2(%arg0: i32) -> (i32, i32) {
    %c0_i32 = arith.constant 0 : i32
    %c0_i32_0 = arith.constant 0 : i32
    %c0_i32_1 = arith.constant 0 : i32
    return %c0_i32, %c0_i32_0 : i32, i32
  }
  func.func @transform_3(%arg0: i32) -> (i32, i32) {
    %c0_i32 = arith.constant 0 : i32
    %c0_i32_0 = arith.constant 0 : i32
    %c0_i32_1 = arith.constant 0 : i32
    return %c0_i32, %c0_i32_0 : i32, i32
  }
  func.func @transform_4(%arg0: i32) -> (i32, i32) {
    %c0_i32 = arith.constant 0 : i32
    %c0_i32_0 = arith.constant 0 : i32
    %c0_i32_1 = arith.constant 0 : i32
    return %c0_i32, %c0_i32_0 : i32, i32
  }
  func.func @transform_5(%arg0: i32) -> (i32, i32) {
    %c0_i32 = arith.constant 0 : i32
    %c0_i32_0 = arith.constant 0 : i32
    %c0_i32_1 = arith.constant 0 : i32
    return %c0_i32, %c0_i32_0 : i32, i32
  }
  func.func @transform_6(%arg0: i32) -> (i32, i32) {
    %c0_i32 = arith.constant 0 : i32
    %c0_i32_0 = arith.constant 0 : i32
    %c0_i32_1 = arith.constant 0 : i32
    return %c0_i32, %c0_i32_0 : i32, i32
  }
  func.func @transform_7(%arg0: i32) -> (i32, i32) {
    %c0_i32 = arith.constant 0 : i32
    %c0_i32_0 = arith.constant 0 : i32
    return %arg0, %c0_i32 : i32, i32
  }
}

</mosaic_0001>

<bundles_post_ra>
// kernel: tpu_custom_call.1
= control target key start
LH: loop header
LB: loop body
LE: loop exit
PB: predicated region body
PF: predicated region fallthrough
CT: control target
= control target key end

     0   :  { %12 = vsyncpa [#allocation3], 0  ;;  %s1962_s24 = smov 0   ;;  %s2580_s0 = inlined_call_operand.vmem [shape: bf16[64,10], index: 0, kind: input, shape index: {}]   ;;  %s2581_s1 = inlined_call_operand.vmem [shape: bf16[10,128], index: 1, kind: input, shape index: {}]   ;;  %s2582_s2 = inlined_call_operand.vmem [shape: f32[1,128], index: 2, kind: input, shape index: {}]   ;;  %s2583_s3 = inlined_call_operand.hbm [shape: bf16[128,1024], index: 3, kind: input, shape index: {}]   ;;  %s2584_s4 = inlined_call_operand.vmem [shape: f32[1,1024], index: 4, kind: input, shape index: {}]   ;;  %s2585_s5 = inlined_call_operand.vmem [shape: f32[4,1024], index: 5, kind: input, shape index: {}]   ;;  %s2586_s6 = inlined_call_operand.vmem [shape: f32[1,4], index: 6, kind: input, shape index: {}]   ;;  %s2587_s7 = inlined_call_operand.vmem [shape: f32[64,4], index: 7, kind: output, shape index: {}]  }
   0x1 LB: > { %s1668_s25 = sadd.s32 4294967295, %s1916_s24   ;;  %p1670_p0 = scmp.ge.s32.totalorder %s1916_s24, 1  ;;  %s1916_s24 = sphi %s1962_s24, %s18_s24  }
   0x2   : > { %p201_p1 = scmp.lt.s32.totalorder %s1916_s24, 3  ;;  %s1918_s26 = smov [#allocation2]  }
   0x3   : > { %s219_s27 = sshll.u32 %s1918_s26, 4  ;;  %p1976_p3 = scmp.eq.s32.totalorder %s1668_s25, 0  ;;  %s220_s27 = int_to_ptr.vmem [resolvable:$true] %s219_s27 }
   0x4   : > { %p1970_p2 = pnand %p1670_p0, %p201_p1  ;;  %s1878_s10 = scalar_lea.hbm %s2583_s3, 8192 }
   0x5   : > { %s2613_s29 = scalar_select %p1976_p3, 1, 0 }
   0x6   : > { %s2612_s28 = scalar_select %p1970_p2, 1, 0 }
   0x7   : > { %p1769_p4 = pneg %p1970_p2  ;;  %p1879_p6 = scmp.ne.s32.totalorder %s2583_s3, %s1878_s10 }
   0x8   : > { %p1885_p10 = scmp.lt.u32.totalorder %s1878_s10, %s2583_s3 }
   0x9   : > { %p1984_p5 = pnand %p1976_p3, %p1769_p4 }
   0xb   : > { %p1880_p7 = pneg %p1984_p5 }
   0xd   : > { %p1881_p8 = pnand %p1880_p7, %p1879_p6 }
   0xf   : > { %p1882_p9 = pneg %p1881_p8 }
  0x11   : > { %p1887_p11 = pnand %p1885_p10, %p1882_p9 }
  0x13   : > { %1890 = shalt.err (!%p1887_p11)
}
  0x14   : > { %s1891_s15 = scalar_lea.vmem %s220_s27, 8192  ;;  %p1899_p1 = scmp.lt.s32.totalorder %s220_s27, %s220_s27 }
  0x15   : > { %p1892_p12 = scmp.ne.s32.totalorder %s220_s27, %s1891_s15  ;;  %p1900_p4 = scmp.lt.s32.totalorder %s1891_s15, %s1891_s15 }
  0x17   : > { %p1894_p13 = pnand %p1892_p12, %p1880_p7  ;;  %p1901_p3 = por %p1900_p4, %p1899_p1 }
  0x19   : > { %p1895_p0 = pneg %p1894_p13 }
  0x1b   : > { %p1902_p2 = pnand %p1901_p3, %p1895_p0 }
  0x1d   : > { %1905 = shalt.err (!%p1902_p2)
}
  0x1e   : > { %s1919_s16 = smov 512   ;;  %s1920_s17 = smov 32  }
  0x1f   : > { %1772 = dma.hbm_to_vmem [thread:$0]  (!%p1984_p5), %s2583_s3, 8192, %s220_s27, [#allocation3], %s1919_s16, %s1919_s16, %s1920_s17  }
  0x20   : > { %p2615_p6 = scmp.ne.s32.totalorder %s2612_s28, 0 }
  0x22   : > { %253 = sbr.rel (%p2615_p6) target bundleno = 1056 (0x420), region = 48 }
  0x29   : > { %p2616_p8 = scmp.ne.s32.totalorder %s2613_s29, 0 }
  0x2b   : > { %1911 = dma.done.wait (%p2616_p8), [#allocation3], 8192  }
  0x2c   : > { %1913 = vsyncadd (%p2616_p8), [#allocation3], 4294959104  ;;  %s1675_s20 = sshll.u32 %s1668_s25, 2  ;;  %vm333_vm0 = vcmask 1044480   ;;  %vm326_vm1 = vcmask 80896   ;;  %v392_v4 = vld [vmem:[#allocation2] sm:$0xff] }
  0x2d   : > { %p286_p2 = scmp.lt.s32.totalorder %s1675_s20, 7  ;;  %v1787_v0 = vld [vmem:[%s2581_s1] sm:$0x1f]   ;;  %v393_v6 = vld [vmem:[#allocation2 + $0x8] sm:$0xff]  ;;  %vm1505_vm2 = vcmask 7168   ;;  %vm1510_vm3 = vcmask 15360  }
  0x2e   : > { %1764 = vmatprep.subr.msk.bf16.mxu0 %vm333_vm0, %v1787_v0  ;;  %v335_v2 = vsel %vm333_vm0, %v1787_v0, 0  ;;  %v396_v5 = vld [vmem:[#allocation2 + $0x20] sm:$0xff]  ;;  %v397_v8 = vld [vmem:[#allocation2 + $0x28] sm:$0xff]  ;;  %vm1515_vm4 = vcmask 23552   ;;  %vm1547_vm5 = vcmask 31744  }
  0x2f   : > { %s2654_s20 = smov (!%p286_p2, %s1675_s20), 7  ;;  %1759 = vmatpush3.bf16.msra.mxu0 %v335_v2  ;;  %v1686_v7 = vcombine.high %v392_v4, %v396_v5  ;;  %v1685_v9 = vcombine.low %v392_v4, %v396_v5  ;;  %v400_v10 = vld [vmem:[#allocation2 + $0x40] sm:$0xff]  ;;  %v1687_v12 = vcombine.low %v393_v6, %v397_v8  ;;  %v1688_v13 = vcombine.high %v393_v6, %v397_v8  ;;  %v401_v15 = vld [vmem:[#allocation2 + $0x48] sm:$0xff]  ;;  %v394_v4 = vld [vmem:[#allocation2 + $0x10] sm:$0xff] }
  0x30   : > { %s1676_s21 = sshll.u32 %s2654_s20, 2  ;;  %v404_v11 = vld [vmem:[#allocation2 + $0x60] sm:$0xff]  ;;  %v405_v16 = vld [vmem:[#allocation2 + $0x68] sm:$0xff]  ;;  %v398_v5 = vld [vmem:[#allocation2 + $0x30] sm:$0xff]  ;;  %s1678_s19 = sshll.u32 %s2654_s20, 3 }
  0x31   : > { %s289_s26 = scalar_lea.vmem %s2580_s0, %s1676_s21  ;;  %v1694_v14 = vcombine.high %v400_v10, %v404_v11  ;;  %v408_v17 = vld [vmem:[#allocation2 + $0x80] sm:$0xff]  ;;  %818 = vmatprep.subr.bf16.mxu1 %v1686_v7  ;;  %v1696_v18 = vcombine.high %v401_v15, %v405_v16  ;;  %v409_v20 = vld [vmem:[#allocation2 + $0x88] sm:$0xff]  ;;  %871 = vmatprep.subr.bf16.mxu0 %v1688_v13  ;;  %v1693_v22 = vcombine.low %v400_v10, %v404_v11  ;;  %v395_v6 = vld [vmem:[#allocation2 + $0x18] sm:$0xff]  ;;  %s295_s23 = scalar_lea.vmem %s2587_s7, %s1678_s19 }
  0x32   : > { %v1788_v1 = vld [vmem:[%s289_s26] sm:$0xff]   ;;  %v1789_v3 = vld [vmem:[%s289_s26 + $0x8] sm:$0xff]   ;;  %819 = vmatpush1.bf16.msra.mxu1 %v1685_v9  ;;  %v1695_v23 = vcombine.low %v401_v15, %v405_v16  ;;  %v1690_v7 = vcombine.high %v394_v4, %v398_v5  ;;  %v399_v8 = vld [vmem:[#allocation2 + $0x38] sm:$0xff]  ;;  %v1689_v9 = vcombine.low %v394_v4, %v398_v5 }
  0x33   : > { %1760 = vmatprep.mubr.msk.bf16.mxu0 %vm326_vm1, %v1788_v1  ;;  %v412_v19 = vld [vmem:[#allocation2 + $0xa0] sm:$0xff]  ;;  %v413_v21 = vld [vmem:[#allocation2 + $0xa8] sm:$0xff]  ;;  %820 = vmatprep.subr.bf16.mxu1 %v1694_v14  ;;  %v1691_v10 = vcombine.low %v395_v6, %v399_v8  ;;  %v1692_v11 = vcombine.high %v395_v6, %v399_v8  ;;  %v443_v4 = vld [vmem:[#allocation2 + $0x198] sm:$0xff] }
  0x34   : > { %1761 = vmatmul.mubr.msk.bf16.vlgmr.msra.gmra.mrb[0].mxu0 %vm326_vm1, %v1789_v3  ;;  %v1702_v24 = vcombine.high %v408_v17, %v412_v19  ;;  %v1704_v25 = vcombine.high %v409_v20, %v413_v21  ;;  %v416_v26 = vld [vmem:[#allocation2 + $0xc0] sm:$0xff]  ;;  %v417_v28 = vld [vmem:[#allocation2 + $0xc8] sm:$0xff]  ;;  %v1701_v30 = vcombine.low %v408_v17, %v412_v19  ;;  %v1703_v31 = vcombine.low %v409_v20, %v413_v21  ;;  %v447_v5 = vld [vmem:[#allocation2 + $0x1b8] sm:$0xff] }
  0x35   : > { %872 = vmatpush1.bf16.msra.mxu0 %v1687_v12  ;;  %v420_v27 = vld [vmem:[#allocation2 + $0xe0] sm:$0xff]  ;;  %v421_v29 = vld [vmem:[#allocation2 + $0xe8] sm:$0xff]  ;;  %v1921_v12 = vmov 0  }
  0x36   : > { %873 = vmatprep.subr.bf16.mxu0 %v1696_v18  ;;  %821 = vmatpush1.bf16.msra.mxu1 %v1693_v22  ;;  %v1710_v32 = vcombine.high %v416_v26, %v420_v27  ;;  %v1712_v33 = vcombine.high %v417_v28, %v421_v29  ;;  %v424_v34 = vld [vmem:[#allocation2 + $0x100] sm:$0xff]  ;;  %v425_v36 = vld [vmem:[#allocation2 + $0x108] sm:$0xff]  ;;  %v1709_v38 = vcombine.low %v416_v26, %v420_v27  ;;  %v402_v22 = vld [vmem:[#allocation2 + $0x50] sm:$0xff] }
  0x37   : > { %822 = vmatprep.subr.bf16.mxu1 %v1702_v24  ;;  %v428_v35 = vld [vmem:[#allocation2 + $0x120] sm:$0xff]  ;;  %v429_v37 = vld [vmem:[#allocation2 + $0x128] sm:$0xff]  ;;  %v1711_v39 = vcombine.low %v417_v28, %v421_v29  ;;  %850 = vmatprep.mubr.bf16.mxu1 %v1921_v12  ;;  %v403_v26 = vld [vmem:[#allocation2 + $0x58] sm:$0xff] }
  0x38   : > { %v1718_v40 = vcombine.high %v424_v34, %v428_v35  ;;  %v1720_v41 = vcombine.high %v425_v36, %v429_v37  ;;  %v432_v42 = vld [vmem:[#allocation2 + $0x140] sm:$0xff]  ;;  %v433_v44 = vld [vmem:[#allocation2 + $0x148] sm:$0xff]  ;;  %v1717_v46 = vcombine.low %v424_v34, %v428_v35  ;;  %v1719_v47 = vcombine.low %v425_v36, %v429_v37  ;;  %903 = vmatprep.mubr.bf16.mxu0 %v1921_v12  ;;  %v407_v27 = vld [vmem:[#allocation2 + $0x78] sm:$0xff] }
  0x39   : > { %874 = vmatpush1.bf16.msra.mxu0 %v1695_v23  ;;  %v436_v43 = vld [vmem:[#allocation2 + $0x160] sm:$0xff]  ;;  %v437_v45 = vld [vmem:[#allocation2 + $0x168] sm:$0xff]  ;;  %v410_v34 = vld [vmem:[#allocation2 + $0x90] sm:$0xff] }
  0x3a   : > { %875 = vmatprep.subr.bf16.mxu0 %v1704_v25  ;;  %823 = vmatpush1.bf16.msra.mxu1 %v1701_v30  ;;  %v1726_v48 = vcombine.high %v432_v42, %v436_v43  ;;  %v1728_v49 = vcombine.high %v433_v44, %v437_v45  ;;  %v1725_v50 = vcombine.low %v432_v42, %v436_v43  ;;  %v440_v52 = vld [vmem:[#allocation2 + $0x180] sm:$0xff]  ;;  %v441_v54 = vld [vmem:[#allocation2 + $0x188] sm:$0xff]  ;;  %v406_v25 = vld [vmem:[#allocation2 + $0x70] sm:$0xff] }
  0x3b   : > { %824 = vmatprep.subr.bf16.mxu1 %v1710_v32  ;;  %v1727_v51 = vcombine.low %v433_v44, %v437_v45  ;;  %v444_v53 = vld [vmem:[#allocation2 + $0x1a0] sm:$0xff]  ;;  %v445_v56 = vld [vmem:[#allocation2 + $0x1a8] sm:$0xff]  ;;  %v1698_v32 = vcombine.high %v402_v22, %v406_v25  ;;  %v414_v35 = vld [vmem:[#allocation2 + $0xb0] sm:$0xff] }
  0x3c   : > { %v1734_v55 = vcombine.high %v440_v52, %v444_v53  ;;  %v1735_v57 = vcombine.low %v441_v54, %v445_v56  ;;  %v1736_v58 = vcombine.high %v441_v54, %v445_v56  ;;  %v1733_v59 = vcombine.low %v440_v52, %v444_v53  ;;  %v448_v60 = vld [vmem:[#allocation2 + $0x1c0] sm:$0xff]  ;;  %v449_v62 = vld [vmem:[#allocation2 + $0x1c8] sm:$0xff]  ;;  %v411_v36 = vld [vmem:[#allocation2 + $0x98] sm:$0xff] }
  0x3d   : > { %876 = vmatpush1.bf16.msra.mxu0 %v1703_v31  ;;  %v452_v61 = vld [vmem:[#allocation2 + $0x1e0] sm:$0xff]  ;;  %v453_v0 = vld [vmem:[#allocation2 + $0x1e8] sm:$0xff]  ;;  %v415_v37 = vld [vmem:[#allocation2 + $0xb8] sm:$0xff] }
  0x3e   : > { %877 = vmatprep.subr.bf16.mxu0 %v1712_v33  ;;  %825 = vmatpush1.bf16.msra.mxu1 %v1709_v38  ;;  %v1742_v63 = vcombine.high %v448_v60, %v452_v61  ;;  %v1743_v1 = vcombine.low %v449_v62, %v453_v0  ;;  %v1744_v2 = vcombine.high %v449_v62, %v453_v0  ;;  %v1679_v13 = vld [vmem:[%s2582_s2] ss:$0 sm:$0xff]  ;;  %v418_v42 = vld [vmem:[#allocation2 + $0xd0] sm:$0xff]  ;;  %v419_v44 = vld [vmem:[#allocation2 + $0xd8] sm:$0xff] }
  0x3f   : > { %826 = vmatprep.subr.bf16.mxu1 %v1718_v40  ;;  %v1741_v3 = vcombine.low %v448_v60, %v452_v61  ;;  %v1700_v33 = vcombine.high %v403_v26, %v407_v27  ;;  %v1697_v38 = vcombine.low %v402_v22, %v406_v25  ;;  %v1706_v40 = vcombine.high %v410_v34, %v414_v35  ;;  %v422_v43 = vld [vmem:[#allocation2 + $0xf0] sm:$0xff]  ;;  %v423_v45 = vld [vmem:[#allocation2 + $0xf8] sm:$0xff]  ;;  %v456_v25 = vld [vmem:[%s2584_s4] sm:$0xff] }
  0x40   : > { %v427_v52 = vld [vmem:[#allocation2 + $0x118] sm:$0xff]  ;;  %v1713_v54 = vcombine.low %v418_v42, %v422_v43 }
  0x41   : > { %878 = vmatpush1.bf16.msra.mxu0 %v1711_v39  ;;  %v1699_v39 = vcombine.low %v403_v26, %v407_v27  ;;  %v431_v53 = vld [vmem:[#allocation2 + $0x138] sm:$0xff] }
  0x42   : > { %879 = vmatprep.subr.bf16.mxu0 %v1720_v41  ;;  %827 = vmatpush1.bf16.msra.mxu1 %v1717_v46  ;;  %v1708_v41 = vcombine.high %v411_v36, %v415_v37  ;;  %v1705_v46 = vcombine.low %v410_v34, %v414_v35  ;;  %v435_v60 = vld [vmem:[#allocation2 + $0x158] sm:$0xff] }
  0x43   : > { %828 = vmatprep.subr.bf16.mxu1 %v1726_v48  ;;  %v1714_v48 = vcombine.high %v418_v42, %v422_v43  ;;  %v439_v61 = vld [vmem:[#allocation2 + $0x178] sm:$0xff] }
  0x45   : > { %880 = vmatpush1.bf16.msra.mxu0 %v1719_v47  ;;  %v1707_v47 = vcombine.low %v411_v36, %v415_v37 }
  0x46   : > { %881 = vmatprep.subr.bf16.mxu0 %v1728_v49  ;;  %829 = vmatpush1.bf16.msra.mxu1 %v1725_v50  ;;  %v1716_v49 = vcombine.high %v419_v44, %v423_v45  ;;  %v426_v50 = vld [vmem:[#allocation2 + $0x110] sm:$0xff] }
  0x47   : > { %830 = vmatprep.subr.bf16.mxu1 %v1734_v55  ;;  %v1715_v55 = vcombine.low %v419_v44, %v423_v45 }
  0x49   : > { %882 = vmatpush1.bf16.msra.mxu0 %v1727_v51  ;;  %v430_v51 = vld [vmem:[#allocation2 + $0x130] sm:$0xff] }
  0x4a   : > { %883 = vmatprep.subr.bf16.mxu0 %v1736_v58  ;;  %831 = vmatpush1.bf16.msra.mxu1 %v1733_v59  ;;  %v1722_v56 = vcombine.high %v426_v50, %v430_v51  ;;  %v434_v58 = vld [vmem:[#allocation2 + $0x150] sm:$0xff]  ;;  %v1721_v62 = vcombine.low %v426_v50, %v430_v51 }
  0x4b   : > { %832 = vmatprep.subr.bf16.mxu1 %v1742_v63  ;;  %v438_v59 = vld [vmem:[#allocation2 + $0x170] sm:$0xff]  ;;  %v1723_v63 = vcombine.low %v427_v52, %v431_v53 }
  0x4c   : > { %v1730_v0 = vcombine.high %v434_v58, %v438_v59  ;;  %v1729_v6 = vcombine.low %v434_v58, %v438_v59 }
  0x4d   : > { %884 = vmatpush1.bf16.msra.mxu0 %v1735_v57  ;;  %v1724_v57 = vcombine.high %v427_v52, %v431_v53  ;;  %v2112_v52 = vld [vmem:[%s2585_s5 + $0x3] ss:$4 sm:$0xff] }
  0x4e   : > { %885 = vmatprep.subr.bf16.mxu0 %v1744_v2  ;;  %833 = vmatpush1.bf16.msra.mxu1 %v1741_v3  ;;  %v442_v2 = vld [vmem:[#allocation2 + $0x190] sm:$0xff] }
  0x4f   : > { %924 = vmatprep.subr.bf16.mxu1 %v1690_v7  ;;  %v446_v3 = vld [vmem:[#allocation2 + $0x1b0] sm:$0xff]  ;;  %v1731_v7 = vcombine.low %v435_v60, %v439_v61 }
  0x50   : > { %v1738_v8 = vcombine.high %v442_v2, %v446_v3 }
  0x51   : > { %886 = vmatpush1.bf16.msra.mxu0 %v1743_v1  ;;  %v1732_v1 = vcombine.high %v435_v60, %v439_v61 }
  0x52   : > { %977 = vmatprep.subr.bf16.mxu0 %v1692_v11  ;;  %v454_v11 = vld [vmem:[#allocation2 + $0x1f0] sm:$0xff] }
 0x107   : > { %v1762_v14 = vpop.f32.mrb[0].mxu0 }
 0x108   : > { %v380_v15 = vadd.f32 %v1762_v14, %v1679_v13  ;;  %v371_v16 = vpop.f32.mrb[1].mxu0  ;;  %v455_v14 = vld [vmem:[#allocation2 + $0x1f8] sm:$0xff] }
 0x109   : > { %v372_v17 = vadd.f32 %v1679_v13, %v371_v16  ;;  %v1763_v18 = vpop.f32.mrb[2].mxu0  ;;  %v1739_v16 = vcombine.low %v443_v4, %v447_v5 }
 0x10a   : > { %v383_v19 = vadd.f32 %v1763_v18, %v1679_v13  ;;  %v374_v20 = vpop.f32.mrb[3].mxu0  ;;  %v388_v23 = vmax.f32 %v380_v15, 0.0  ;;  %v1737_v15 = vcombine.low %v442_v2, %v446_v3 }
 0x10b   : > { %v375_v21 = vadd.f32 %v1679_v13, %v374_v20  ;;  %v386_v28 = vmax.f32 %v372_v17, 0.0  ;;  %v451_v13 = vld [vmem:[#allocation2 + $0x1d8] sm:$0xff] }
 0x10c   : > { %v389_v24 = vmax.f32 %v383_v19, 0.0  ;;  %v1748_v18 = vcombine.high %v451_v13, %v455_v14  ;;  %v1747_v20 = vcombine.low %v451_v13, %v455_v14 }
 0x10d   : > { %v387_v29 = vmax.f32 %v375_v21, 0.0  ;;  %v458_v21 = vlaneseq }
 0x10e   : > { %v2028_v30 = vpack.c.bf16 %v389_v24, %v388_v23 }
 0x10f   : > { %v2030_v31 = vpack.c.bf16 %v387_v29, %v386_v28  ;;  %v459_v22 = vshrl.u32 %v458_v21, 7  ;;  %v2052_v28 = vld [vmem:[%s2585_s5] ss:$4 sm:$0xff] }
 0x111   : > { %851 = vmatmul.mubr.bf16.vlgmr.msra.gmra.mrb[0].mxu1 %v2030_v31  ;;  %904 = vmatmul.mubr.bf16.vlgmr.msra.gmra.mrb[4].mxu0 %v2030_v31  ;;  %v460_v23 = vsub.s32 0, %v459_v22  ;;  %v468_v24 = vsub.s32 2, %v459_v22  ;;  %v464_v26 = vsub.s32 1, %v459_v22  ;;  %v472_v27 = vsub.s32 3, %v459_v22 }
 0x112   : > { %925 = vmatpush1.bf16.msra.mxu1 %v1689_v9  ;;  %978 = vmatpush1.bf16.msra.mxu0 %v1691_v10  ;;  %v1740_v9 = vcombine.high %v443_v4, %v447_v5  ;;  %v450_v10 = vld [vmem:[#allocation2 + $0x1d0] sm:$0xff]  ;;  %v2072_v34 = vsub.s32 4, %v459_v22  ;;  %v2119_v58 = vsub.s32 6, %v459_v22 }
 0x113   : > { %926 = vmatprep.subr.bf16.mxu1 %v1698_v32  ;;  %979 = vmatprep.subr.bf16.mxu0 %v1700_v33  ;;  %v1746_v17 = vcombine.high %v450_v10, %v454_v11  ;;  %v1745_v19 = vcombine.low %v450_v10, %v454_v11  ;;  %v2059_v29 = vrot.slane %v456_v25, %v460_v23 }
 0x114   : > { %860 = vmatprep.mubr.bf16.mxu1 %v1921_v12  ;;  %913 = vmatprep.mubr.bf16.mxu0 %v1921_v12  ;;  %v2068_v32 = vrot.slane %v456_v25, %v464_v26  ;;  %v2070_v33 = vrot.slane %v456_v25, %v472_v27  ;;  %v2075_v35 = vrot.slane %v2052_v28, %v460_v23 }
 0x115   : > { %v2078_v36 = vrot.slane %v2052_v28, %v464_v26  ;;  %v2081_v37 = vrot.slane %v2052_v28, %v468_v24  ;;  %v2090_v42 = vrot.slane %v2052_v28, %v472_v27  ;;  %v2131_v2 = vrot.slane %v2112_v52, %v460_v23 }
 0x116   : > { %927 = vmatpush1.bf16.msra.mxu1 %v1697_v38  ;;  %980 = vmatpush1.bf16.msra.mxu0 %v1699_v39  ;;  %v2135_v4 = vrot.slane %v2112_v52, %v464_v26  ;;  %v2138_v5 = vrot.slane %v2112_v52, %v468_v24  ;;  %v2155_v11 = vrot.slane %v2052_v28, %v2072_v34 }
 0x117   : > { %928 = vmatprep.subr.bf16.mxu1 %v1706_v40  ;;  %981 = vmatprep.subr.bf16.mxu0 %v1708_v41 }
 0x118   : > { %2617 = vst [vmem:[#allocation5_spill] sm:$0xff] %v2135_v4  ;;  %2618 = vst [vmem:[#allocation6_spill] sm:$0xff] %v2138_v5 }
 0x119   : > { %861 = vmatmul.mubr.bf16.gmra.mrb[4].mxu1 %v2028_v30  ;;  %914 = vmatmul.mubr.bf16.gmra.mrb[8].mxu0 %v2028_v30 }
 0x11a   : > { %929 = vmatpush1.bf16.msra.mxu1 %v1705_v46  ;;  %982 = vmatpush1.bf16.msra.mxu0 %v1707_v47 }
 0x11b   : > { %930 = vmatprep.subr.bf16.mxu1 %v1714_v48  ;;  %983 = vmatprep.subr.bf16.mxu0 %v1716_v49 }
 0x11c   : > { %956 = vmatprep.mubr.bf16.mxu1 %v1921_v12  ;;  %1009 = vmatprep.mubr.bf16.mxu0 %v1921_v12 }
 0x11e   : > { %931 = vmatpush1.bf16.msra.mxu1 %v1713_v54  ;;  %984 = vmatpush1.bf16.msra.mxu0 %v1715_v55 }
 0x11f   : > { %932 = vmatprep.subr.bf16.mxu1 %v1722_v56  ;;  %985 = vmatprep.subr.bf16.mxu0 %v1724_v57  ;;  %v2117_v57 = vrot.slane %v456_v25, %v2072_v34 }
 0x122   : > { %933 = vmatpush1.bf16.msra.mxu1 %v1721_v62  ;;  %986 = vmatpush1.bf16.msra.mxu0 %v1723_v63  ;;  %v2122_v62 = vsub.s32 5, %v459_v22  ;;  %v2124_v63 = vsub.s32 7, %v459_v22 }
 0x123   : > { %934 = vmatprep.subr.bf16.mxu1 %v1730_v0  ;;  %987 = vmatprep.subr.bf16.mxu0 %v1732_v1 }
 0x124   : > { %v2151_v10 = vrot.slane %v456_v25, %v2124_v63  ;;  %v2173_v22 = vrot.slane %v2052_v28, %v2122_v62 }
 0x126   : > { %935 = vmatpush1.bf16.msra.mxu1 %v1729_v6  ;;  %988 = vmatpush1.bf16.msra.mxu0 %v1731_v7  ;;  %v2142_v7 = vrot.slane %v456_v25, %v2119_v58  ;;  %2622 = vst [vmem:[#allocation10_spill] sm:$0xff] %v2173_v22 }
 0x127   : > { %936 = vmatprep.subr.bf16.mxu1 %v1738_v8  ;;  %989 = vmatprep.subr.bf16.mxu0 %v1740_v9  ;;  %v2145_v8 = vrot.slane %v2112_v52, %v472_v27  ;;  %v2148_v9 = vrot.slane %v456_v25, %v2122_v62 }
 0x129   : > { %2619 = vst [vmem:[#allocation7_spill] sm:$0xff] %v2145_v8 }
 0x12a   : > { %937 = vmatpush1.bf16.msra.mxu1 %v1737_v15  ;;  %990 = vmatpush1.bf16.msra.mxu0 %v1739_v16  ;;  %v2159_v15 = vrot.slane %v2052_v28, %v2119_v58 }
 0x12b   : > { %938 = vmatprep.subr.bf16.mxu1 %v1746_v17  ;;  %991 = vmatprep.subr.bf16.mxu0 %v1748_v18 }
 0x12c   : > { %2620 = vst [vmem:[#allocation8_spill] sm:$0xff] %v2159_v15 }
 0x12e   : > { %939 = vmatpush1.bf16.msra.mxu1 %v1745_v19  ;;  %992 = vmatpush1.bf16.msra.mxu0 %v1747_v20 }
 0x131   : > { %957 = vmatmul.mubr.bf16.vlgmr.msra.gmra.mrb[8].mxu1 %v2030_v31  ;;  %1010 = vmatmul.mubr.bf16.vlgmr.msra.gmra.mrb[12].mxu0 %v2030_v31  ;;  %v2066_v31 = vld [vmem:[%s2585_s5 + $0x2] ss:$4 sm:$0xff] }
 0x132   : > { %966 = vmatprep.mubr.bf16.mxu1 %v1921_v12  ;;  %1019 = vmatprep.mubr.bf16.mxu0 %v1921_v12  ;;  %v2057_v12 = vld [vmem:[%s2585_s5 + $0x1] ss:$4 sm:$0xff]  ;;  %v2099_v45 = vrot.slane %v2066_v31, %v460_v23  ;;  %v2104_v50 = vrot.slane %v2066_v31, %v464_v26  ;;  %v2107_v51 = vrot.slane %v2066_v31, %v468_v24 }
 0x133   : > { %v2084_v38 = vrot.slane %v2057_v12, %v460_v23  ;;  %v2087_v39 = vrot.slane %v2057_v12, %v468_v24  ;;  %v2093_v43 = vrot.slane %v2057_v12, %v464_v26  ;;  %v2096_v44 = vrot.slane %v2057_v12, %v472_v27 }
 0x134   : > { %v2128_v1 = vrot.slane %v2066_v31, %v472_v27  ;;  %v2163_v16 = vrot.slane %v2057_v12, %v2072_v34  ;;  %v2167_v17 = vrot.slane %v2057_v12, %v2119_v58  ;;  %v2179_v27 = vrot.slane %v2052_v28, %v2124_v63 }
 0x135   : > { %v2193_v28 = vrot.slane %v2066_v31, %v2072_v34 }
 0x136   : > { %2621 = vst [vmem:[#allocation9_spill] sm:$0xff] %v2167_v17  ;;  %2623 = vst [vmem:[#allocation11_spill] sm:$0xff] %v2179_v27 }
 0x139   : > { %967 = vmatmul.mubr.bf16.gmra.mrb[12].mxu1 %v2028_v30  ;;  %1020 = vmatmul.mubr.bf16.gmra.mrb[16].mxu0 %v2028_v30  ;;  %v2061_v30 = vrot.slane %v456_v25, %v468_v24 }
 0x1e4   : > { %v852_v40 = vpop.f32.mrb[0].mxu1  ;;  %v905_v41 = vpop.f32.mrb[4].mxu0 }
 0x1e5   : > { %v853_v46 = vadd.f32 %v852_v40, %v2059_v29  ;;  %v906_v47 = vadd.f32 %v905_v41, %v2061_v30  ;;  %v854_v48 = vpop.f32.mrb[1].mxu1  ;;  %v907_v49 = vpop.f32.mrb[5].mxu0 }
 0x1e6   : > { %v855_v53 = vadd.f32 %v854_v48, %v2068_v32  ;;  %v908_v54 = vadd.f32 %v907_v49, %v2070_v33  ;;  %v856_v55 = vpop.f32.mrb[2].mxu1  ;;  %v909_v56 = vpop.f32.mrb[6].mxu0  ;;  %v2188_v48 = vrot.slane %v2057_v12, %v2124_v63 }
 0x1e7   : > { %1790 = vtanh.f32 %v853_v46  ;;  %v857_v59 = vadd.f32 %v856_v55, %v2059_v29  ;;  %v858_v60 = vpop.f32.mrb[3].mxu1  ;;  %v911_v61 = vpop.f32.mrb[7].mxu0  ;;  %v910_v0 = vadd.f32 %v909_v56, %v2061_v30  ;;  %v2202_v55 = vrot.slane %v2066_v31, %v2119_v58 }
 0x1e8   : > { %1792 = vtanh.f32 %v906_v47  ;;  %v859_v3 = vadd.f32 %v858_v60, %v2068_v32  ;;  %v912_v6 = vadd.f32 %v911_v61, %v2070_v33  ;;  %v2184_v47 = vrot.slane %v2057_v12, %v2122_v62  ;;  %2625 = vst [vmem:[#allocation13_spill] sm:$0xff] %v2188_v48 }
 0x1e9   : > { %1794 = vtanh.f32 %v855_v53  ;;  %2627 = vst [vmem:[#allocation15_spill] sm:$0xff] %v2202_v55  ;;  %v2206_v12 = vrot.slane %v2066_v31, %v2124_v63 }
 0x1ea   : > { %1796 = vtanh.f32 %v908_v54  ;;  %2624 = vst [vmem:[#allocation12_spill] sm:$0xff] %v2184_v47 }
 0x1eb   : > { %1798 = vtanh.f32 %v857_v59  ;;  %2628 = vst [vmem:[#allocation16_spill] sm:$0xff] %v2206_v12 }
 0x1ec   : > { %1800 = vtanh.f32 %v910_v0  ;;  %v862_v13 = vpop.f32.mrb[4].mxu1  ;;  %v915_v14 = vpop.f32.mrb[8].mxu0 }
 0x1ed   : > { %1802 = vtanh.f32 %v859_v3  ;;  %v863_v18 = vadd.f32 %v862_v13, %v2059_v29  ;;  %v916_v19 = vadd.f32 %v915_v14, %v2061_v30  ;;  %v864_v20 = vpop.f32.mrb[5].mxu1  ;;  %v917_v21 = vpop.f32.mrb[9].mxu0 }
 0x1ee   : > { %1804 = vtanh.f32 %v912_v6  ;;  %v865_v23 = vadd.f32 %v864_v20, %v2068_v32  ;;  %v918_v24 = vadd.f32 %v917_v21, %v2070_v33  ;;  %v866_v25 = vpop.f32.mrb[6].mxu1  ;;  %v919_v26 = vpop.f32.mrb[10].mxu0 }
 0x1ef   : > { %1806 = vtanh.f32 %v863_v18  ;;  %v867_v40 = vadd.f32 %v866_v25, %v2059_v29  ;;  %v868_v41 = vpop.f32.mrb[7].mxu1  ;;  %v921_v46 = vpop.f32.mrb[11].mxu0  ;;  %v920_v49 = vadd.f32 %v919_v26, %v2061_v30  ;;  %v2197_v29 = vrot.slane %v2066_v31, %v2122_v62 }
 0x1f0   : > { %1808 = vtanh.f32 %v916_v19  ;;  %v869_v54 = vadd.f32 %v868_v41, %v2068_v32  ;;  %v922_v56 = vadd.f32 %v921_v46, %v2070_v33 }
 0x1f1   : > { %2626 = vst [vmem:[#allocation14_spill] sm:$0xff] %v2197_v29  ;;  %v1791_v53 = vpop.eup %1790  ;;  %1810 = vtanh.f32 %v865_v23 }
 0x1f2   : > { %v1793_v30 = vpop.eup %1792  ;;  %1812 = vtanh.f32 %v918_v24  ;;  %v1104_v59 = vmul.f32 %v1791_v53, %v2075_v35  ;;  %v1215_v60 = vmul.f32 %v1791_v53, %v2084_v38  ;;  %v1326_v3 = vmul.f32 %v1791_v53, %v2099_v45 }
 0x1f3   : > { %v1795_v61 = vpop.eup %1794  ;;  %1814 = vtanh.f32 %v867_v40  ;;  %v1106_v32 = vmul.f32 %v1793_v30, %v2081_v37  ;;  %v1217_v0 = vmul.f32 %v1793_v30, %v2087_v39  ;;  %v1328_v20 = vmul.f32 %v1793_v30, %v2107_v51 }
 0x1f4   : > { %v1797_v6 = vpop.eup %1796  ;;  %1816 = vtanh.f32 %v920_v49  ;;  %v1105_v31 = vmul.f32 %v1795_v61, %v2078_v36  ;;  %v1216_v13 = vmul.f32 %v1795_v61, %v2093_v43  ;;  %v1327_v33 = vmul.f32 %v1795_v61, %v2104_v50 }
 0x1f5   : > { %v1799_v14 = vpop.eup %1798  ;;  %1818 = vtanh.f32 %v869_v54  ;;  %v1107_v18 = vmul.f32 %v1797_v6, %v2090_v42  ;;  %v1218_v19 = vmul.f32 %v1797_v6, %v2096_v44  ;;  %v1329_v26 = vmul.f32 %v1797_v6, %v2128_v1 }
 0x1f6   : > { %v1801_v21 = vpop.eup %1800  ;;  %v1136_v23 = vadd.f32 %v1105_v31, %v1104_v59  ;;  %v1112_v24 = vmul.f32 %v1799_v14, %v2075_v35  ;;  %v1247_v25 = vadd.f32 %v1216_v13, %v1215_v60  ;;  %1820 = vtanh.f32 %v922_v56 }
 0x1f7   : > { %v1803_v40 = vpop.eup %1802  ;;  %v1114_v41 = vmul.f32 %v1801_v21, %v2081_v37  ;;  %v1223_v46 = vmul.f32 %v1799_v14, %v2084_v38  ;;  %v1358_v49 = vadd.f32 %v1327_v33, %v1326_v3  ;;  %v1225_v31 = vmul.f32 %v1801_v21, %v2087_v39 }
 0x1f8   : > { %v1805_v54 = vpop.eup %1804  ;;  %v1137_v12 = vadd.f32 %v1136_v23, %v1106_v32  ;;  %v1113_v48 = vmul.f32 %v1803_v40, %v2078_v36  ;;  %v1248_v29 = vadd.f32 %v1247_v25, %v1217_v0  ;;  %v1224_v27 = vmul.f32 %v1803_v40, %v2093_v43 }
 0x1f9   : > { %v2226_v59 = vpop.eup %1806  ;;  %v1115_v60 = vmul.f32 %v1805_v54, %v2090_v42  ;;  %v1359_v13 = vadd.f32 %v1358_v49, %v1328_v20  ;;  %v1334_v56 = vmul.f32 %v1799_v14, %v2099_v45  ;;  %v1226_v23 = vmul.f32 %v1805_v54, %v2096_v44 }
 0x1fa   : > { %v2231_v55 = vpop.eup %1808  ;;  %v2233_v17 = vadd.f32 %v1137_v12, %v1107_v18  ;;  %v1145_v3 = vadd.f32 %v1113_v48, %v1112_v24  ;;  %v2235_v32 = vadd.f32 %v1248_v29, %v1218_v19  ;;  %v1256_v33 = vadd.f32 %v1224_v27, %v1223_v46 }
 0x1fb   : > { %2629 = vst [vmem:[#allocation17_spill] sm:$0xff] %v2231_v55  ;;  %v2237_v0 = vpop.eup %1810  ;;  %v2240_v25 = vadd.f32 %v1359_v13, %v1329_v26  ;;  %v1335_v15 = vmul.f32 %v1803_v40, %v2104_v50  ;;  %v1336_v20 = vmul.f32 %v1801_v21, %v2107_v51  ;;  %v1437_v12 = vmul.f32 %v1791_v53, %v2131_v2 }
 0x1fc   : > { %2630 = vst [vmem:[#allocation18_spill] sm:$0xff] %v2237_v0  ;;  %v2244_v49 = vpop.eup %1812  ;;  %v1146_v47 = vadd.f32 %v1145_v3, %v1114_v41  ;;  %v1257_v22 = vadd.f32 %v1256_v33, %v1225_v31  ;;  %v1438_v48 = vmul.f32 %v1795_v61, %v2135_v4  ;;  %v1337_v27 = vmul.f32 %v1805_v54, %v2128_v1 }
 0x1fd   : > { %2631 = vst [vmem:[#allocation19_spill] sm:$0xff] %v2244_v49  ;;  %v2248_v29 = vpop.eup %1814  ;;  %v1367_v18 = vadd.f32 %v1335_v15, %v1334_v56  ;;  %v1439_v19 = vmul.f32 %v1793_v30, %v2138_v5  ;;  %v1120_v24 = vmul.f32 %v2226_v59, %v2075_v35  ;;  %v1121_v53 = vmul.f32 %v2237_v0, %v2078_v36 }
 0x1fe   : > { %2632 = vst [vmem:[#allocation20_spill] sm:$0xff] %v2248_v29  ;;  %v2254_v26 = vpop.eup %1816  ;;  %v2256_v46 = vadd.f32 %v1146_v47, %v1115_v60  ;;  %v2258_v41 = vadd.f32 %v1257_v22, %v1226_v23  ;;  %v1469_v31 = vadd.f32 %v1438_v48, %v1437_v12  ;;  %v1440_v15 = vmul.f32 %v1797_v6, %v2145_v8 }
 0x1ff   : > { %2633 = vst [vmem:[#allocation21_spill] sm:$0xff] %v2254_v26  ;;  %v2262_v61 = vpop.eup %1818  ;;  %v1368_v13 = vadd.f32 %v1367_v18, %v1336_v20  ;;  %v1122_v30 = vmul.f32 %v2231_v55, %v2081_v37  ;;  %v1445_v56 = vmul.f32 %v1799_v14, %v2131_v2  ;;  %v1123_v47 = vmul.f32 %v2244_v49, %v2090_v42 }
 0x200   : > { %2634 = vst [vmem:[#allocation22_spill] sm:$0xff] %v2262_v61  ;;  %v1470_v3 = vadd.f32 %v1469_v31, %v1439_v19  ;;  %v1154_v22 = vadd.f32 %v1121_v53, %v1120_v24  ;;  %v1446_v60 = vmul.f32 %v1803_v40, %v2135_v4  ;;  %v2271_v33 = vpop.eup %1820  ;;  %v1447_v20 = vmul.f32 %v1801_v21, %v2138_v5 }
 0x201   : > { %v2273_v23 = vadd.f32 %v1368_v13, %v1337_v27  ;;  %v1342_v6 = vmul.f32 %v2226_v59, %v2099_v45  ;;  %v1343_v12 = vmul.f32 %v2237_v0, %v2104_v50  ;;  %v1448_v18 = vmul.f32 %v1805_v54, %v2145_v8 }
 0x202   : > { %v2280_v14 = vadd.f32 %v1470_v3, %v1440_v15  ;;  %v1155_v48 = vadd.f32 %v1154_v22, %v1122_v30  ;;  %v1478_v19 = vadd.f32 %v1446_v60, %v1445_v56  ;;  %v1344_v40 = vmul.f32 %v2231_v55, %v2107_v51 }
 0x203   : > { %v1376_v24 = vadd.f32 %v1343_v12, %v1342_v6  ;;  %v1231_v27 = vmul.f32 %v2226_v59, %v2084_v38  ;;  %v1232_v21 = vmul.f32 %v2237_v0, %v2093_v43  ;;  %v1345_v30 = vmul.f32 %v2244_v49, %v2128_v1 }
 0x204   : > { %v958_v31 = vpop.f32.mrb[8].mxu1  ;;  %v1011_v53 = vpop.f32.mrb[12].mxu0  ;;  %v2289_v13 = vadd.f32 %v1155_v48, %v1123_v47  ;;  %v1479_v15 = vadd.f32 %v1478_v19, %v1447_v20  ;;  %v1233_v54 = vmul.f32 %v2231_v55, %v2087_v39  ;;  %v1234_v5 = vmul.f32 %v2244_v49, %v2096_v44 }
 0x205   : > { %v959_v56 = vadd.f32 %v958_v31, %v2117_v57  ;;  %v1012_v3 = vadd.f32 %v1011_v53, %v2142_v7  ;;  %v960_v22 = vpop.f32.mrb[9].mxu1  ;;  %v1013_v60 = vpop.f32.mrb[13].mxu0  ;;  %v1377_v6 = vadd.f32 %v1376_v24, %v1344_v40  ;;  %v1265_v12 = vadd.f32 %v1232_v21, %v1231_v27 }
 0x206   : > { %v961_v8 = vadd.f32 %v960_v22, %v2148_v9  ;;  %v1014_v47 = vadd.f32 %v1013_v60, %v2151_v10  ;;  %v962_v48 = vpop.f32.mrb[10].mxu1  ;;  %v1015_v20 = vpop.f32.mrb[14].mxu0  ;;  %v2299_v19 = vadd.f32 %v1479_v15, %v1448_v18  ;;  %v1128_v40 = vmul.f32 %v2248_v29, %v2075_v35 }
 0x207   : > { %1822 = vtanh.f32 %v959_v56  ;;  %v963_v31 = vadd.f32 %v962_v48, %v2117_v57  ;;  %v964_v55 = vpop.f32.mrb[11].mxu1  ;;  %v1017_v53 = vpop.f32.mrb[15].mxu0  ;;  %v2304_v0 = vadd.f32 %v1377_v6, %v1345_v30  ;;  %v1016_v24 = vadd.f32 %v1015_v20, %v2142_v7 }
 0x208   : > { %1824 = vtanh.f32 %v1012_v3  ;;  %v965_v27 = vadd.f32 %v964_v55, %v2148_v9  ;;  %v1266_v18 = vadd.f32 %v1265_v12, %v1233_v54  ;;  %v1018_v21 = vadd.f32 %v1017_v53, %v2151_v10 }
 0x209   : > { %1826 = vtanh.f32 %v961_v8  ;;  %v1129_v15 = vmul.f32 %v2262_v61, %v2078_v36  ;;  %v1130_v56 = vmul.f32 %v2254_v26, %v2081_v37  ;;  %v1239_v35 = vmul.f32 %v2248_v29, %v2084_v38 }
 0x20a   : > { %1828 = vtanh.f32 %v1014_v47  ;;  %v2315_v30 = vadd.f32 %v1266_v18, %v1234_v5  ;;  %v1240_v3 = vmul.f32 %v2262_v61, %v2093_v43  ;;  %v1131_v8 = vmul.f32 %v2271_v33, %v2090_v42 }
 0x20b   : > { %1830 = vtanh.f32 %v963_v31  ;;  %v1163_v55 = vadd.f32 %v1129_v15, %v1128_v40  ;;  %v1241_v36 = vmul.f32 %v2254_v26, %v2087_v39  ;;  %v1350_v5 = vmul.f32 %v2248_v29, %v2099_v45 }
 0x20c   : > { %1832 = vtanh.f32 %v1016_v24  ;;  %v968_v54 = vpop.f32.mrb[12].mxu1  ;;  %v1021_v37 = vpop.f32.mrb[16].mxu0  ;;  %v1274_v22 = vadd.f32 %v1240_v3, %v1239_v35  ;;  %v1351_v38 = vmul.f32 %v2262_v61, %v2104_v50  ;;  %v2334_v20 = vrot.slane %v2112_v52, %v2072_v34 }
 0x20d   : > { %1834 = vtanh.f32 %v965_v27  ;;  %v969_v43 = vadd.f32 %v968_v54, %v2117_v57  ;;  %v1022_v60 = vadd.f32 %v1021_v37, %v2142_v7  ;;  %v970_v42 = vpop.f32.mrb[13].mxu1  ;;  %v1023_v6 = vpop.f32.mrb[17].mxu0  ;;  %v1164_v12 = vadd.f32 %v1163_v55, %v1130_v56  ;;  %v2636_v37 = vld [vmem:[#allocation12_spill] sm:$0xff] }
 0x20e   : > { %v971_v39 = vadd.f32 %v970_v42, %v2148_v9  ;;  %v972_v47 = vpop.f32.mrb[14].mxu1  ;;  %v1025_v48 = vpop.f32.mrb[18].mxu0  ;;  %v1242_v45 = vmul.f32 %v2271_v33, %v2096_v44  ;;  %v1275_v50 = vadd.f32 %v1274_v22, %v1241_v36  ;;  %1836 = vtanh.f32 %v1018_v21  ;;  %v2639_v42 = vld [vmem:[#allocation15_spill] sm:$0xff] }
 0x20f   : > { %v1024_v31 = vadd.f32 %v1023_v6, %v2151_v10  ;;  %v974_v53 = vpop.f32.mrb[15].mxu1  ;;  %v1027_v40 = vpop.f32.mrb[19].mxu0  ;;  %v2341_v24 = vrot.slane %v2112_v52, %v2119_v58  ;;  %v2343_v27 = vadd.f32 %v1164_v12, %v1131_v8  ;;  %1838 = vtanh.f32 %v969_v43  ;;  %v2638_v43 = vld [vmem:[#allocation9_spill] sm:$0xff] }
 0x210   : > { %v973_v18 = vadd.f32 %v972_v47, %v2117_v57  ;;  %v2348_v34 = vrot.slane %v2112_v52, %v2122_v62  ;;  %v2350_v44 = vadd.f32 %v1275_v50, %v1242_v45  ;;  %1840 = vtanh.f32 %v1022_v60  ;;  %v2640_v45 = vld [vmem:[#allocation11_spill] sm:$0xff] }
 0x211   : > { %v2352_v21 = vpop.eup %1822  ;;  %v1026_v15 = vadd.f32 %v1025_v48, %v2142_v7  ;;  %v2357_v58 = vrot.slane %v2112_v52, %v2124_v63  ;;  %v2359_v56 = vadd.f32 %v1351_v38, %v1350_v5  ;;  %1842 = vtanh.f32 %v971_v39  ;;  %v2637_v38 = vld [vmem:[#allocation8_spill] sm:$0xff] }
 0x212   : > { %v2361_v35 = vpop.eup %1824  ;;  %v975_v57 = vadd.f32 %v974_v53, %v2148_v9  ;;  %v1108_v62 = vmul.f32 %v2352_v21, %v2155_v11  ;;  %v1219_v3 = vmul.f32 %v2352_v21, %v2163_v16  ;;  %1844 = vtanh.f32 %v1024_v31  ;;  %v2635_v9 = vld [vmem:[#allocation10_spill] sm:$0xff] }
 0x213   : > { %v1827_v8 = vpop.eup %1826  ;;  %v1028_v7 = vadd.f32 %v1027_v40, %v2151_v10  ;;  %v1330_v52 = vmul.f32 %v2352_v21, %v2193_v28  ;;  %v2373_v63 = vmul.f32 %v2254_v26, %v2107_v51  ;;  %1846 = vtanh.f32 %v973_v18 }
 0x214   : > { %v2375_v55 = vpop.eup %1828  ;;  %v1109_v36 = vmul.f32 %v1827_v8, %v2635_v9  ;;  %v1139_v54 = vadd.f32 %v2233_v17, %v1108_v62  ;;  %v1220_v22 = vmul.f32 %v1827_v8, %v2636_v37  ;;  %v1110_v10 = vmul.f32 %v2361_v35, %v2637_v38 }
 0x215   : > { %v2380_v5 = vpop.eup %1830  ;;  %v1221_v60 = vmul.f32 %v2361_v35, %v2638_v43  ;;  %v1250_v51 = vadd.f32 %v2235_v32, %v1219_v3  ;;  %v1332_v6 = vmul.f32 %v2361_v35, %v2639_v42  ;;  %1848 = vtanh.f32 %v1026_v15  ;;  %v2641_v32 = vld [vmem:[#allocation14_spill] sm:$0xff] }
 0x216   : > { %v2389_v12 = vpop.eup %1832  ;;  %v1140_v39 = vadd.f32 %v1139_v54, %v1109_v36  ;;  %v1116_v17 = vmul.f32 %v2380_v5, %v2155_v11  ;;  %v1227_v47 = vmul.f32 %v2380_v5, %v2163_v16  ;;  %1850 = vtanh.f32 %v975_v57  ;;  %v2642_v54 = vld [vmem:[#allocation13_spill] sm:$0xff] }
 0x217   : > { %v1835_v48 = vpop.eup %1834  ;;  %v1111_v50 = vmul.f32 %v2375_v55, %v2640_v45  ;;  %v1251_v31 = vadd.f32 %v1250_v51, %v1220_v22  ;;  %v1331_v53 = vmul.f32 %v1827_v8, %v2641_v32  ;;  %v1118_v36 = vmul.f32 %v2389_v12, %v2637_v38 }
 0x218   : > { %v1141_v40 = vadd.f32 %v1140_v39, %v1110_v10  ;;  %v1117_v18 = vmul.f32 %v1835_v48, %v2635_v9  ;;  %v1148_v15 = vadd.f32 %v2256_v46, %v1116_v17  ;;  %v1228_v62 = vmul.f32 %v1835_v48, %v2636_v37  ;;  %v2401_v3 = vpop.eup %1836 }
 0x219   : > { %v1222_v57 = vmul.f32 %v2375_v55, %v2642_v54  ;;  %v1252_v26 = vadd.f32 %v1251_v31, %v1221_v60  ;;  %v1259_v22 = vadd.f32 %v2258_v41, %v1227_v47  ;;  %v2408_v51 = vpop.eup %1838  ;;  %v1229_v46 = vmul.f32 %v2389_v12, %v2638_v43 }
 0x21a   : > { %v1142_v10 = vadd.f32 %v1141_v40, %v1111_v50  ;;  %v1149_v39 = vadd.f32 %v1148_v15, %v1117_v18  ;;  %v1361_v17 = vadd.f32 %v2240_v25, %v1330_v52  ;;  %v2413_v49 = vpop.eup %1840  ;;  %v1338_v4 = vmul.f32 %v2380_v5, %v2193_v28 }
 0x21b   : > { %v1253_v61 = vadd.f32 %v1252_v26, %v1222_v57  ;;  %v1260_v29 = vadd.f32 %v1259_v22, %v1228_v62  ;;  %v1339_v60 = vmul.f32 %v1835_v48, %v2641_v32  ;;  %v2418_v31 = vpop.eup %1842  ;;  %v1119_v41 = vmul.f32 %v2401_v3, %v2640_v45  ;;  %v2643_v22 = vld [vmem:[#allocation16_spill] sm:$0xff] }
 0x21c   : > { %1143 = vadd.xlane.f32.xlu0 %v1142_v10  ;;  %v1150_v47 = vadd.f32 %v1149_v39, %v1118_v36  ;;  %v1230_v50 = vmul.f32 %v2401_v3, %v2642_v54  ;;  %v1362_v25 = vadd.f32 %v1361_v17, %v1331_v53  ;;  %v2424_v52 = vpop.eup %1844  ;;  %v1370_v40 = vadd.f32 %v2273_v23, %v1338_v4 }
 0x21d   : > { %v1261_v26 = vadd.f32 %v1260_v29, %v1229_v46  ;;  %v1441_v18 = vmul.f32 %v2352_v21, %v2334_v20  ;;  %v1442_v15 = vmul.f32 %v1827_v8, %v2348_v34  ;;  %v2430_v62 = vpop.eup %1846  ;;  %v1333_v36 = vmul.f32 %v2375_v55, %v2643_v22 }
 0x21e   : > { %v1151_v57 = vadd.f32 %v1150_v47, %v1119_v41  ;;  %v1363_v10 = vadd.f32 %v1362_v25, %v1332_v6  ;;  %v1340_v53 = vmul.f32 %v2389_v12, %v2639_v42  ;;  %v1371_v17 = vadd.f32 %v1370_v40, %v1339_v60 }
 0x21f   : > { %v1262_v39 = vadd.f32 %v1261_v26, %v1230_v50  ;;  %v1472_v29 = vadd.f32 %v2280_v14, %v1441_v18  ;;  %v1124_v4 = vmul.f32 %v2408_v51, %v2155_v11  ;;  %v2439_v23 = vpop.eup %1848  ;;  %1852 = vtanh.f32 %v1028_v7 }
 0x220   : > { %1152 = vadd.xlane.f32.xlu1 %v1151_v57  ;;  %1254 = vadd.xlane.f32.xlu0 %v1253_v61  ;;  %v1364_v21 = vadd.f32 %v1363_v10, %v1333_v36  ;;  %v1341_v8 = vmul.f32 %v2401_v3, %v2643_v22  ;;  %v1125_v6 = vmul.f32 %v2418_v31, %v2635_v9  ;;  %v2445_v46 = vpop.eup %1850 }
 0x221   : > { %v1372_v60 = vadd.f32 %v1371_v17, %v1340_v53  ;;  %v1443_v14 = vmul.f32 %v2361_v35, %v2341_v24  ;;  %v1473_v41 = vadd.f32 %v1472_v29, %v1442_v15  ;;  %v1157_v47 = vadd.f32 %v2289_v13, %v1124_v4 }
 0x222   : > { %v1444_v7 = vmul.f32 %v2375_v55, %v2357_v58  ;;  %v1126_v61 = vmul.f32 %v2413_v49, %v2637_v38  ;;  %v1449_v50 = vmul.f32 %v2380_v5, %v2334_v20  ;;  %v1450_v25 = vmul.f32 %v1835_v48, %v2348_v34 }
 0x223   : > { %v1373_v26 = vadd.f32 %v1372_v60, %v1341_v8  ;;  %v1474_v40 = vadd.f32 %v1473_v41, %v1443_v14  ;;  %v1158_v18 = vadd.f32 %v1157_v47, %v1125_v6  ;;  %v1346_v35 = vmul.f32 %v2408_v51, %v2193_v28 }
 0x224   : > { %1263 = vadd.xlane.f32.xlu1 %v1262_v39  ;;  %1365 = vadd.xlane.f32.xlu0 %v1364_v21  ;;  %v1127_v13 = vmul.f32 %v2424_v52, %v2640_v45  ;;  %v1481_v55 = vadd.f32 %v2299_v19, %v1449_v50  ;;  %v1347_v15 = vmul.f32 %v2418_v31, %v2641_v32 }
 0x225   : > { %v1475_v57 = vadd.f32 %v1474_v40, %v1444_v7  ;;  %v1159_v5 = vadd.f32 %v1158_v18, %v1126_v61  ;;  %v1451_v48 = vmul.f32 %v2389_v12, %v2341_v24  ;;  %v1379_v36 = vadd.f32 %v2304_v0, %v1346_v35 }
 0x226   : > { %v1452_v10 = vmul.f32 %v2401_v3, %v2357_v58  ;;  %v1482_v53 = vadd.f32 %v1481_v55, %v1450_v25  ;;  %v1235_v39 = vmul.f32 %v2408_v51, %v2163_v16  ;;  %v1236_v19 = vmul.f32 %v2418_v31, %v2636_v37 }
 0x227   : > { %v1160_v17 = vadd.f32 %v1159_v5, %v1127_v13  ;;  %v1348_v29 = vmul.f32 %v2413_v49, %v2639_v42  ;;  %v1380_v4 = vadd.f32 %v1379_v36, %v1347_v15  ;;  %v1132_v12 = vmul.f32 %v2430_v62, %v2155_v11  ;;  %v2646_v36 = vld [vmem:[#allocation6_spill] sm:$0xff] }
 0x228   : > { %1374 = vadd.xlane.f32.xlu1 %v1373_v26  ;;  %1476 = vadd.xlane.f32.xlu0 %v1475_v57  ;;  %v1483_v0 = vadd.f32 %v1482_v53, %v1451_v48  ;;  %v1268_v3 = vadd.f32 %v2315_v30, %v1235_v39  ;;  %v1133_v21 = vmul.f32 %v2445_v46, %v2635_v9  ;;  %v2645_v57 = vld [vmem:[#allocation18_spill] sm:$0xff]  ;;  %v2648_v39 = vld [vmem:[#allocation20_spill] sm:$0xff] }
 0x229   : > { %v1349_v8 = vmul.f32 %v2424_v52, %v2643_v22  ;;  %v1381_v6 = vadd.f32 %v1380_v4, %v1348_v29  ;;  %v1237_v60 = vmul.f32 %v2413_v49, %v2638_v43  ;;  %v1166_v14 = vadd.f32 %v2343_v27, %v1132_v12  ;;  %v2485_v41 = vpop.eup %1852  ;;  %v2650_v29 = vld [vmem:[#allocation7_spill] sm:$0xff] }
 0x22a   : > { %v1484_v11 = vadd.f32 %v1483_v0, %v1452_v10  ;;  %v1269_v47 = vadd.f32 %v1268_v3, %v1236_v19  ;;  %v1243_v7 = vmul.f32 %v2430_v62, %v2163_v16  ;;  %v1244_v30 = vmul.f32 %v2445_v46, %v2636_v37  ;;  %v2647_v10 = vld [vmem:[#allocation17_spill] sm:$0xff]  ;;  %v2651_v4 = vld [vmem:[#allocation19_spill] sm:$0xff] }
 0x22b   : > { %v1382_v9 = vadd.f32 %v1381_v6, %v1349_v8  ;;  %v1134_v61 = vmul.f32 %v2439_v23, %v2637_v38  ;;  %v1167_v50 = vadd.f32 %v1166_v14, %v1133_v21  ;;  %v1353_v25 = vmul.f32 %v2271_v33, %v2128_v1  ;;  %v2652_v6 = vld [vmem:[#allocation21_spill] sm:$0xff] }
 0x22c   : > { %1161 = vadd.xlane.f32.xlu1 %v1160_v17  ;;  %1485 = vadd.xlane.f32.xlu0 %v1484_v11  ;;  %v1238_v27 = vmul.f32 %v2424_v52, %v2642_v54  ;;  %v1270_v26 = vadd.f32 %v1269_v47, %v1237_v60  ;;  %v1277_v40 = vadd.f32 %v2350_v44, %v1243_v7 }
 0x22d   : > { %v1135_v16 = vmul.f32 %v2485_v41, %v2640_v45  ;;  %v1168_v37 = vadd.f32 %v1167_v50, %v1134_v61  ;;  %v1245_v18 = vmul.f32 %v2439_v23, %v2638_v43  ;;  %v1354_v38 = vmul.f32 %v2430_v62, %v2193_v28  ;;  %v2644_v45 = vld [vmem:[#allocation5_spill] sm:$0xff] }
 0x22e   : > { %v1271_v35 = vadd.f32 %v1270_v26, %v1238_v27  ;;  %v1278_v1 = vadd.f32 %v1277_v40, %v1244_v30  ;;  %v1386_v13 = vadd.f32 %v2359_v56, %v2373_v63  ;;  %v1453_v55 = vmul.f32 %v2226_v59, %v2131_v2 }
 0x22f   : > { %v1169_v15 = vadd.f32 %v1168_v37, %v1135_v16  ;;  %v1246_v44 = vmul.f32 %v2485_v41, %v2642_v54  ;;  %v1454_v5 = vmul.f32 %v2645_v57, %v2644_v45  ;;  %v1355_v28 = vmul.f32 %v2445_v46, %v2641_v32  ;;  %v2649_v54 = vld [vmem:[#allocation22_spill] sm:$0xff] }
 0x230   : > { %1383 = vadd.xlane.f32.xlu1 %v1382_v9  ;;  %1272 = vadd.xlane.f32.xlu0 %v1271_v35  ;;  %v1279_v43 = vadd.f32 %v1278_v1, %v1245_v18  ;;  %v1387_v48 = vadd.f32 %v1386_v13, %v1353_v25  ;;  %v1455_v56 = vmul.f32 %v2647_v10, %v2646_v36 }
 0x231   : > { %v1487_v63 = vadd.f32 %v1454_v5, %v1453_v55  ;;  %v1461_v19 = vmul.f32 %v2648_v39, %v2131_v2  ;;  %v1462_v17 = vmul.f32 %v2649_v54, %v2644_v45  ;;  %v1456_v12 = vmul.f32 %v2651_v4, %v2650_v29 }
 0x232   : > { %v1280_v53 = vadd.f32 %v1279_v43, %v1246_v44  ;;  %v1388_v59 = vadd.f32 %v1387_v48, %v1354_v38  ;;  %v1457_v0 = vmul.f32 %v2408_v51, %v2334_v20  ;;  %v1356_v3 = vmul.f32 %v2439_v23, %v2639_v42 }
 0x233   : > { %v1488_v32 = vadd.f32 %v1487_v63, %v1455_v56  ;;  %v1458_v8 = vmul.f32 %v2418_v31, %v2348_v34  ;;  %v1463_v60 = vmul.f32 %v2652_v6, %v2646_v36  ;;  %v1496_v14 = vadd.f32 %v1462_v17, %v1461_v19 }
 0x234   : > { %1170 = vadd.xlane.f32.xlu1 %v1169_v15  ;;  %1281 = vadd.xlane.f32.xlu0 %v1280_v53  ;;  %v1389_v21 = vadd.f32 %v1388_v59, %v1355_v28  ;;  %v1357_v11 = vmul.f32 %v2485_v41, %v2643_v22  ;;  %v1464_v7 = vmul.f32 %v2271_v33, %v2650_v29 }
 0x235   : > { %v1489_v2 = vadd.f32 %v1488_v32, %v1456_v12  ;;  %v1465_v42 = vmul.f32 %v2430_v62, %v2334_v20  ;;  %v1497_v30 = vadd.f32 %v1496_v14, %v1463_v60  ;;  %v1459_v31 = vmul.f32 %v2413_v49, %v2341_v24 }
 0x236   : > { %v1390_v47 = vadd.f32 %v1389_v21, %v1356_v3  ;;  %v1466_v50 = vmul.f32 %v2445_v46, %v2348_v34  ;;  %v1460_v22 = vmul.f32 %v2424_v52, %v2357_v58  ;;  %v1467_v20 = vmul.f32 %v2439_v23, %v2341_v24  ;;  %v1752_v24 = vld [vmem:[%s2586_s6] ss:$0 sm:$0xff] }
 0x237   : > { %v1490_v51 = vadd.f32 %v1489_v2, %v1457_v0  ;;  %v1498_v25 = vadd.f32 %v1497_v30, %v1464_v7  ;;  %v1468_v49 = vmul.f32 %v2485_v41, %v2357_v58 }
 0x238   : > { %v1391_v9 = vadd.f32 %v1390_v47, %v1357_v11 }
 0x239   : > { %v1491_v61 = vadd.f32 %v1490_v51, %v1458_v8  ;;  %v1499_v26 = vadd.f32 %v1498_v25, %v1465_v42 }
 0x23a   : > { %1392 = vadd.xlane.f32.xlu1 %v1391_v9 }
 0x23b   : > { %v1492_v27 = vadd.f32 %v1491_v61, %v1459_v31  ;;  %v1500_v62 = vadd.f32 %v1499_v26, %v1466_v50 }
 0x23d   : > { %v1493_v33 = vadd.f32 %v1492_v27, %v1460_v22  ;;  %v1501_v40 = vadd.f32 %v1500_v62, %v1467_v20 }
 0x23f   : > { %1494 = vadd.xlane.f32.xlu0 %v1493_v33  ;;  %v1502_v16 = vadd.f32 %v1501_v40, %v1468_v49 }
 0x241   : > { %1503 = vadd.xlane.f32.xlu1 %v1502_v16 }
 0x2a9   : > { %v1144_v34 = vpop.xlane.xlu0 %1143 }
 0x2ad   : > { %v1153_v46 = vpop.xlane.xlu1 %1152  ;;  %v1255_v37 = vpop.xlane.xlu0 %1254 }
 0x2ae   : > { %v1506_v38 = vsel %vm1505_vm2, %v1144_v34, %v1255_v37 }
 0x2b1   : > { %v1264_v18 = vpop.xlane.xlu1 %1263  ;;  %v1366_v52 = vpop.xlane.xlu0 %1365 }
 0x2b2   : > { %v1511_v23 = vsel %vm1510_vm3, %v1506_v38, %v1366_v52  ;;  %v1507_v13 = vsel %vm1505_vm2, %v1153_v46, %v1264_v18 }
 0x2b5   : > { %v1375_v58 = vpop.xlane.xlu1 %1374  ;;  %v1477_v41 = vpop.xlane.xlu0 %1476 }
 0x2b6   : > { %v1516_v35 = vsel %vm1515_vm4, %v1511_v23, %v1477_v41  ;;  %v1512_v55 = vsel %vm1510_vm3, %v1507_v13, %v1375_v58 }
 0x2b7   : > { %v1527_v1 = vadd.f32 %v1752_v24, %v1516_v35 }
 0x2b9   : > { %v1531_v15 = vmul.f32 0.5, %v1527_v1  ;;  %v1162_v44 = vpop.xlane.xlu1 %1161  ;;  %v1486_v45 = vpop.xlane.xlu0 %1485 }
 0x2ba   : > { %v1517_v57 = vsel %vm1515_vm4, %v1512_v55, %v1486_v45 }
 0x2bb   : > { %1854 = vtanh.f32 %v1531_v15  ;;  %v1528_v5 = vadd.f32 %v1752_v24, %v1517_v57 }
 0x2bd   : > { %v1532_v43 = vmul.f32 0.5, %v1528_v5  ;;  %v1384_v28 = vpop.xlane.xlu1 %1383  ;;  %v1273_v48 = vpop.xlane.xlu0 %1272 }
 0x2be   : > { %v1508_v39 = vsel %vm1505_vm2, %v1162_v44, %v1273_v48 }
 0x2bf   : > { %1856 = vtanh.f32 %v1532_v43  ;;  %v1513_v29 = vsel %vm1510_vm3, %v1508_v39, %v1384_v28 }
 0x2c1   : > { %v1171_v36 = vpop.xlane.xlu1 %1170  ;;  %v1282_v56 = vpop.xlane.xlu0 %1281 }
 0x2c2   : > { %v1509_v0 = vsel %vm1505_vm2, %v1171_v36, %v1282_v56 }
 0x2c5   : > { %v1855_v10 = vpop.eup %1854 }
 0x2c6   : > { %v1539_v63 = vadd.f32 1.0, %v1855_v10 }
 0x2c7   : > { %v1393_v19 = vpop.xlane.xlu1 %1392 }
 0x2c8   : > { %v1543_v53 = vmul.f32 0.5, %v1539_v63  ;;  %v1514_v8 = vsel %vm1510_vm3, %v1509_v0, %v1393_v19 }
 0x2c9   : > { %v1857_v59 = vpop.eup %1856 }
 0x2ca   : > { %v1548_v54 = vsel %vm1547_vm5, %v1543_v53, -inf  ;;  %v1540_v17 = vadd.f32 1.0, %v1857_v59 }
 0x2cb   : > { %1549 = vmax.xlane.f32.xlu0 %v1548_v54 }
 0x2cc   : > { %v1495_v4 = vpop.xlane.xlu0 %1494  ;;  %v1544_v12 = vmul.f32 0.5, %v1540_v17 }
 0x2cd   : > { %v1518_v32 = vsel %vm1515_vm4, %v1513_v29, %v1495_v4 }
 0x2ce   : > { %v1529_v3 = vadd.f32 %v1752_v24, %v1518_v32  ;;  %v1551_v21 = vsel %vm1547_vm5, %v1544_v12, -inf  ;;  %v1504_v6 = vpop.xlane.xlu1 %1503 }
 0x2cf   : > { %1552 = vmax.xlane.f32.xlu1 %v1551_v21  ;;  %v1519_v60 = vsel %vm1515_vm4, %v1514_v8, %v1504_v6 }
 0x2d0   : > { %v1533_v2 = vmul.f32 0.5, %v1529_v3  ;;  %v1530_v14 = vadd.f32 %v1752_v24, %v1519_v60 }
 0x2d2   : > { %1858 = vtanh.f32 %v1533_v2  ;;  %v1534_v11 = vmul.f32 0.5, %v1530_v14 }
 0x2d4   : > { %1860 = vtanh.f32 %v1534_v11 }
 0x2dc   : > { %v1859_v47 = vpop.eup %1858 }
 0x2dd   : > { %v1541_v51 = vadd.f32 1.0, %v1859_v47 }
 0x2de   : > { %v1861_v42 = vpop.eup %1860 }
 0x2df   : > { %v1545_v7 = vmul.f32 0.5, %v1541_v51  ;;  %v1542_v9 = vadd.f32 1.0, %v1861_v42 }
 0x2e1   : > { %v1554_v30 = vsel %vm1547_vm5, %v1545_v7, -inf  ;;  %v1546_v31 = vmul.f32 0.5, %v1542_v9 }
 0x2e2   : > { %1555 = vmax.xlane.f32.xlu0 %v1554_v30 }
 0x2e3   : > { %v1557_v61 = vsel %vm1547_vm5, %v1546_v31, -inf }
 0x2e4   : > { %1558 = vmax.xlane.f32.xlu1 %v1557_v61 }
 0x358   : > { %v1550_v50 = vpop.xlane.xlu0 %1549 }
 0x359   : > { %v1560_v25 = vsub.f32 %v1543_v53, %v1550_v50 }
 0x35b   : > { %v1564_v22 = vmul.f32 1.442695, %v1560_v25 }
 0x35c   : > { %v1553_v27 = vpop.xlane.xlu1 %1552 }
 0x35d   : > { %1862 = vpow2.f32 %v1564_v22  ;;  %v1561_v26 = vsub.f32 %v1544_v12, %v1553_v27 }
 0x35f   : > { %v1566_v33 = vmul.f32 1.442695, %v1561_v26 }
 0x361   : > { %1864 = vpow2.f32 %v1566_v33 }
 0x367   : > { %v1863_v20 = vpop.eup %1862 }
 0x368   : > { %v1572_v62 = vsel %vm1547_vm5, %v1863_v20, 0.0 }
 0x369   : > { %1573 = vadd.xlane.f32.xlu0 %v1572_v62 }
 0x36b   : > { %v1865_v49 = vpop.eup %1864 }
 0x36c   : > { %v1575_v40 = vsel %vm1547_vm5, %v1865_v49, 0.0 }
 0x36d   : > { %1576 = vadd.xlane.f32.xlu1 %v1575_v40 }
 0x36f   : > { %v1556_v16 = vpop.xlane.xlu0 %1555 }
 0x370   : > { %v1562_v34 = vsub.f32 %v1545_v7, %v1556_v16 }
 0x371   : > { %v1559_v37 = vpop.xlane.xlu1 %1558 }
 0x372   : > { %v1568_v46 = vmul.f32 1.442695, %v1562_v34  ;;  %v1563_v18 = vsub.f32 %v1546_v31, %v1559_v37 }
 0x374   : > { %1866 = vpow2.f32 %v1568_v46  ;;  %v1570_v52 = vmul.f32 1.442695, %v1563_v18 }
 0x376   : > { %1868 = vpow2.f32 %v1570_v52 }
 0x37e   : > { %v1867_v38 = vpop.eup %1866 }
 0x37f   : > { %v1578_v24 = vsel %vm1547_vm5, %v1867_v38, 0.0 }
 0x380   : > { %1579 = vadd.xlane.f32.xlu0 %v1578_v24  ;;  %v1869_v23 = vpop.eup %1868 }
 0x381   : > { %v1581_v58 = vsel %vm1547_vm5, %v1869_v23, 0.0 }
 0x382   : > { %1582 = vadd.xlane.f32.xlu1 %v1581_v58 }
 0x3f6   : > { %v1574_v41 = vpop.xlane.xlu0 %1573 }
 0x3f7   : > { %1870 = vlog2.f32 %v1574_v41 }
 0x3fa   : > { %v1577_v35 = vpop.xlane.xlu1 %1576 }
 0x3fb   : > { %1872 = vlog2.f32 %v1577_v35 }
 0x401   : > { %v1871_v1 = vpop.eup %1870 }
 0x402   : > { %v1585_v13 = vmul.f32 0.6931472, %v1871_v1 }
 0x404   : > { %v1592_v55 = vsub.f32 %v1560_v25, %v1585_v13 }
 0x405   : > { %v1873_v15 = vpop.eup %1872 }
 0x406   : > { %1596 = vst.msk [vmem:[%s295_s23] sm:$0xff] %vm1547_vm5, %v1592_v55  ;;  %v1587_v44 = vmul.f32 0.6931472, %v1873_v15 }
 0x408   : > { %v1593_v45 = vsub.f32 %v1561_v26, %v1587_v44 }
 0x40a   : > { %1597 = vst.msk [vmem:[%s295_s23 + $0x8] sm:$0xff] %vm1547_vm5, %v1593_v45 }
 0x40d   : > { %v1580_v57 = vpop.xlane.xlu0 %1579 }
 0x40e   : > { %1874 = vlog2.f32 %v1580_v57 }
 0x40f   : > { %v1583_v5 = vpop.xlane.xlu1 %1582 }
 0x410   : > { %1876 = vlog2.f32 %v1583_v5 }
 0x418   : > { %v1875_v43 = vpop.eup %1874 }
 0x419   : > { %v1589_v28 = vmul.f32 0.6931472, %v1875_v43 }
 0x41a   : > { %v1877_v36 = vpop.eup %1876 }
 0x41b   : > { %v1594_v48 = vsub.f32 %v1562_v34, %v1589_v28  ;;  %v1591_v10 = vmul.f32 0.6931472, %v1877_v36 }
 0x41d   : > { %1598 = vst.msk [vmem:[%s295_s23 + $0x10] sm:$0xff] %vm1547_vm5, %v1594_v48  ;;  %v1595_v56 = vsub.f32 %v1563_v18, %v1591_v10 }
 0x41f   : > { %1599 = vst.msk [vmem:[%s295_s23 + $0x18] sm:$0xff] %vm1547_vm5, %v1595_v56 }
 0x420 PF: > { %s18_s24 = sadd.s32 1, %s1916_s24  }
 0x421   : > { %p15_p3 = scmp.ge.s32.totalorder %s18_s24, 4  }
 0x423   :  { %17 = sbr.rel (!%p15_p3) target bundleno = 1 (0x1), region = 86 }
 0x42a   :  { %1622 = vsyncpa [#allocation3], 1 }
 0x42b   :  { %1624 = vsyncpa [#allocation3 + $0x1], 1 }

</bundles_post_ra>
